<compile_context>
chip_gen: v7x
topology: tpu7x:2x2x1
jax: 0.10.0
libtpu: 0.0.40
codegen_flags: <defaults>
</compile_context>

<pallas_src>
import math
import functools

import jax
import jax.numpy as jnp
from jax import lax
from jax.experimental import pallas as pl
from jax.experimental.pallas import tpu as pltpu


def _round_up(a, b):
    return ((a + b - 1) // b) * b


def _vmem_limit(needed_bytes):
    # Generous headroom on top of what the tiles need, capped under the v7x
    # 64 MiB/TC physical VMEM (also valid on v5e/v6e, whose physical is 128 MiB).
    return int(min(60 << 20, max(needed_bytes + (8 << 20), 32 << 20)))


# ---------------------------------------------------------------------------
# Path 1: table resident in VMEM, gather via one-hot MXU matmul per token tile
# ---------------------------------------------------------------------------
def _token_embed_onehot_kernel(ids_ref, table_ref, out_ref, *, scale):
    # ids_ref:   (T, 1)  int32  VMEM
    # table_ref: (V, D)         VMEM (full table, same block every grid step)
    # out_ref:   (T, D)         VMEM
    ids = ids_ref[...]                                     # (T, 1)
    tt = ids.shape[0]
    v = table_ref.shape[0]
    onehot = (lax.broadcasted_iota(jnp.int32, (tt, v), 1) == ids)
    onehot = onehot.astype(table_ref.dtype)                # (T, V)
    acc = jnp.dot(onehot, table_ref[...], preferred_element_type=jnp.float32)
    out_ref[...] = (acc * scale).astype(out_ref.dtype)


# ---------------------------------------------------------------------------
# Path 2: table in HBM, per-row DMA gather with a depth-deep pipelined ring
# ---------------------------------------------------------------------------
def _token_embed_hbm_gather_kernel(ids_ref, table_hbm, out_ref, row_buf, sem, *,
                                   scale, token_tile, chunk, depth):
    # ids_ref:   (N_pad,)          int32 SMEM (scalar prefetch)
    # table_hbm: (V, D)            HBM   (memory_space=pl.ANY, never copied whole)
    # out_ref:   (token_tile, D)   VMEM  output tile for this grid step
    # row_buf:   (depth, chunk, D) VMEM  ring of gathered rows
    # sem:       (depth,)          DMA semaphores, one per ring slot
    n_chunks = token_tile // chunk
    base = pl.program_id(0) * token_tile

    def issue_chunk(c, slot):
        # `chunk` independent (1, D) row copies HBM -> VMEM, all signaled on sem[slot].
        for t in range(chunk):
            tok = ids_ref[base + c * chunk + t]
            pltpu.make_async_copy(
                table_hbm.at[pl.ds(tok, 1), :],
                row_buf.at[slot, pl.ds(t, 1), :],
                sem.at[slot],
            ).start()

    def wait_chunk(slot):
        # DMA semaphores count completed bytes: a single descriptor sized to the
        # whole slot (chunk x D) drains all `chunk` equally-sized (1, D) row
        # copies issued above in one wait.
        # Invariant: every copy signaled on sem[slot] is exactly D * itemsize bytes.
        pltpu.make_async_copy(
            table_hbm.at[pl.ds(0, chunk), :],
            row_buf.at[slot],
            sem.at[slot],
        ).wait()

    # Prime the ring with up to `depth` chunks in flight.
    for c in range(min(depth, n_chunks)):
        issue_chunk(c, c)

    for c in range(n_chunks):
        slot = c % depth
        wait_chunk(slot)
        rows = row_buf[slot].astype(jnp.float32) * scale
        out_ref[pl.ds(c * chunk, chunk), :] = rows.astype(out_ref.dtype)
        nxt = c + depth
        if nxt < n_chunks:              # refill the slot we just consumed
            issue_chunk(nxt, slot)


# ---------------------------------------------------------------------------
# Wrapper
# ---------------------------------------------------------------------------
def token_embedding(x, table, *, padding_idx=0, token_tile=256, chunk=32, depth=2,
                    vmem_table_max_bytes=8 << 20, onehot_max_vocab=4096,
                    force_path=None):
    """x: (B, S) int token ids; table: (V, D). Returns (B, S, D) in table.dtype.

    depth: ring depth for the HBM-gather path (use 3-4 on v7x to keep more
    bytes in flight against its ~3.2 TB/s HBM).
    force_path: None (auto), "vmem_onehot", or "hbm_gather".
    """
    B, S = x.shape
    V, D = table.shape
    N = B * S
    scale = math.sqrt(float(D))
    itemsize = jnp.dtype(table.dtype).itemsize
    sub = 8 if itemsize >= 4 else 16          # sublane multiple for the dtype

    table_bytes = V * D * itemsize
    use_onehot = (table_bytes <= vmem_table_max_bytes) and (V <= onehot_max_vocab)
    if force_path == "vmem_onehot":
        use_onehot = True
    elif force_path == "hbm_gather":
        use_onehot = False
    # TODO(synk): add an in-VMEM dynamic-row-load gather for tables that fit VMEM
    # but whose vocabulary is too large for the one-hot matmul to be worthwhile.

    # Map invalid ids to padding_idx (zero row) instead of an arbitrary row
    # (nn.Embedding would raise on them).
    ids = x.reshape(-1).astype(jnp.int32)
    ids = jnp.where((ids >= 0) & (ids < V), ids, jnp.int32(padding_idx))

    # Effective tile: big enough to amortize per-grid-step overhead, small enough
    # not to over-pad tiny inputs; multiple of chunk (HBM path) / sublane.
    if use_onehot:
        tile = _round_up(min(token_tile, _round_up(N, sub)), sub)
    else:
        chunk = _round_up(chunk, sub)
        tile = _round_up(min(token_tile, _round_up(N, chunk)), chunk)

    n_tiles = pl.cdiv(N, tile)
    if n_tiles >= 2 and n_tiles % 2 == 1:
        n_tiles += 1                # even grid -> both v7x TensorCores stay busy
    n_pad = n_tiles * tile

    ids_pad = jnp.full((n_pad,), padding_idx, dtype=jnp.int32).at[:N].set(ids)
    out_dtype = table.dtype

    if use_onehot:
        vmem_need = (2 * table_bytes + 2 * tile * D * itemsize
                     + tile * V * 4 + 2 * tile * 4)
        out_flat = pl.pallas_call(
            functools.partial(_token_embed_onehot_kernel, scale=scale),
            out_shape=jax.ShapeDtypeStruct((n_pad, D), out_dtype),
            grid_spec=pltpu.PrefetchScalarGridSpec(
                num_scalar_prefetch=0,
                grid=(n_tiles,),
                in_specs=[
                    pl.BlockSpec((tile, 1), lambda i: (i, 0)),   # ids tile
                    pl.BlockSpec((V, D), lambda i: (0, 0)),      # full table in VMEM
                ],
                out_specs=pl.BlockSpec((tile, D), lambda i: (i, 0)),
            ),
            compiler_params=pltpu.CompilerParams(
                dimension_semantics=("parallel",),
                vmem_limit_bytes=_vmem_limit(vmem_need)),
        )(ids_pad.reshape(n_pad, 1), table)
    else:
        vmem_need = 2 * tile * D * itemsize + depth * chunk * D * itemsize
        kernel = functools.partial(
            _token_embed_hbm_gather_kernel, scale=scale,
            token_tile=tile, chunk=chunk, depth=depth)
        out_flat = pl.pallas_call(
            kernel,
            out_shape=jax.ShapeDtypeStruct((n_pad, D), out_dtype),
            grid_spec=pltpu.PrefetchScalarGridSpec(
                num_scalar_prefetch=1,                          # ids -> SMEM
                grid=(n_tiles,),
                in_specs=[pl.BlockSpec(memory_space=pl.ANY)],   # table stays in HBM
                out_specs=pl.BlockSpec((tile, D), lambda i, ids: (i, 0)),
                scratch_shapes=[
                    pltpu.VMEM((depth, chunk, D), table.dtype),
                    pltpu.SemaphoreType.DMA((depth,)),
                ],
            ),
            compiler_params=pltpu.CompilerParams(
                dimension_semantics=("parallel",),              # each step self-contained
                vmem_limit_bytes=_vmem_limit(vmem_need)),
        )(ids_pad, table)

    return out_flat[:N].reshape(B, S, D)


def init_embedding_table(key, vocab_size, d_model, padding_idx=0):
    # nn.Embedding default init: N(0, 1); padding_idx row is zeroed.
    w = jax.random.normal(key, (vocab_size, d_model), dtype=jnp.float32)
    w = w.at[padding_idx].set(0.0)
    return w


if __name__ == "__main__":
    vocab_size = 256
    d_model = 128
    batch, seq = 2, 16
    padding_idx = 0

    key = jax.random.PRNGKey(0)
    k_tab, k_ids = jax.random.split(key)

    table = init_embedding_table(k_tab, vocab_size, d_model, padding_idx)
    x = jax.random.randint(k_ids, (batch, seq), minval=0, maxval=vocab_size,
                           dtype=jnp.int32)
    x = x.at[0, 0].set(padding_idx)      # exercise padding_idx semantics

    # Auto path: small table -> VMEM-resident one-hot MXU gather.
    out = jax.block_until_ready(token_embedding(x, table, padding_idx=padding_idx))

    # Also exercise the large-vocab HBM DMA-gather path (forced, small tiles so
    # the pipeline + aggregated waits + multi-tile grid are all covered).
    out_hbm = jax.block_until_ready(
        token_embedding(x, table, padding_idx=padding_idx,
                        token_tile=16, chunk=8, depth=2,
                        force_path="hbm_gather"))

    # Reference check (plain JAX).
    ref = jnp.take(table, x, axis=0) * math.sqrt(d_model)
    assert out.shape == (batch, seq, d_model)
    assert jnp.allclose(out, ref, atol=1e-5, rtol=1e-5)
    assert jnp.allclose(out_hbm, ref, atol=1e-5, rtol=1e-5)
    assert jnp.allclose(out[0, 0], jnp.zeros((d_model,)))   # padding row stays zero

    print("KERNEL_OK")
</pallas_src>

<mosaic_0001>
module attributes {stable_mosaic.version = 11 : i64} {
  func.func @_token_embed_onehot_kernel(%arg0: i32, %arg1: memref<32x1xi32, #tpu.memory_space<vmem>>, %arg2: memref<256x128xf32, #tpu.memory_space<vmem>>, %arg3: memref<32x128xf32, #tpu.memory_space<vmem>>) attributes {dimension_semantics = [#tpu.dimension_semantics<parallel>], iteration_bounds = array<i64: 1>, scalar_prefetch = 0 : i64, scratch_operands = 0 : i64, tpu.core_type = #tpu.core_type<tc>, window_params = [{transform_indices = @transform_0, window_bounds = array<i64: 32, 1>}, {pipeline_mode = #tpu.pipeline_mode<synchronous>, transform_indices = @transform_1, window_bounds = array<i64: 256, 128>}, {transform_indices = @transform_2, window_bounds = array<i64: 32, 128>}]} {
    %c0 = arith.constant 0 : index
    %c0_0 = arith.constant 0 : index
    %0 = vector.load %arg1[%c0, %c0_0] : memref<32x1xi32, #tpu.memory_space<vmem>>, vector<32x1xi32>
    %1 = tpu.iota {dimensions = array<i32: 1>} : vector<32x256xi32>
    %2 = vector.broadcast %0 : vector<32x1xi32> to vector<32x256xi32>
    %3 = arith.cmpi eq, %1, %2 : vector<32x256xi32>
    %4 = arith.extui %3 : vector<32x256xi1> to vector<32x256xi32>
    %5 = arith.sitofp %4 : vector<32x256xi32> to vector<32x256xf32>
    %c0_1 = arith.constant 0 : index
    %c0_2 = arith.constant 0 : index
    %6 = vector.load %arg2[%c0_1, %c0_2] : memref<256x128xf32, #tpu.memory_space<vmem>>, vector<256x128xf32>
    %cst = arith.constant dense<0.000000e+00> : vector<32x128xf32>
    %7 = tpu.matmul %5, %6, %cst {dimension_numbers = #tpu.dot_dimension_numbers<[1], [0], [0], [1], [0, 0, 1, 1], [], []>} : vector<32x256xf32>, vector<256x128xf32>, vector<32x128xf32> -> vector<32x128xf32>
    %cst_3 = arith.constant 11.3137083 : f32
    %8 = vector.broadcast %cst_3 : f32 to vector<32x128xf32>
    %9 = arith.mulf %7, %8 : vector<32x128xf32>
    %c0_4 = arith.constant 0 : index
    %c0_5 = arith.constant 0 : index
    %10 = vector.load %arg3[%c0_4, %c0_5] : memref<32x128xf32, #tpu.memory_space<vmem>>, vector<32x128xf32>
    tpu.vector_store %arg3[%c0_4, %c0_5], %9 {strides = array<i32>} : memref<32x128xf32, #tpu.memory_space<vmem>>, vector<32x128xf32>,
    return
  }
  func.func @transform_0(%arg0: i32) -> (i32, i32) {
    %c0_i32 = arith.constant 0 : i32
    %c0_i32_0 = arith.constant 0 : i32
    return %arg0, %c0_i32 : i32, i32
  }
  func.func @transform_1(%arg0: i32) -> (i32, i32) {
    %c0_i32 = arith.constant 0 : i32
    %c0_i32_0 = arith.constant 0 : i32
    %c0_i32_1 = arith.constant 0 : i32
    return %c0_i32, %c0_i32_0 : i32, i32
  }
  func.func @transform_2(%arg0: i32) -> (i32, i32) {
    %c0_i32 = arith.constant 0 : i32
    %c0_i32_0 = arith.constant 0 : i32
    return %arg0, %c0_i32 : i32, i32
  }
}

</mosaic_0001>

<bundles_post_ra>
// kernel: tpu_custom_call.1
= control target key start
LH: loop header
LB: loop body
LE: loop exit
PB: predicated region body
PF: predicated region fallthrough
CT: control target
= control target key end

     0   :  { %7 = vsyncpa [#allocation3], 0  ;;  %s438_s0 = inlined_call_operand.vmem [shape: s32[32,1], index: 0, kind: input, shape index: {}]   ;;  %s439_s1 = inlined_call_operand.hbm [shape: f32[256,128], index: 1, kind: input, shape index: {}]   ;;  %s440_s2 = inlined_call_operand.hbm [shape: f32[32,128], index: 2, kind: output, shape index: {}]  }
   0x1   :  { %8 = vsyncpa [#allocation4], 0  ;;  %s375_s9 = smov [#allocation2]   ;;  %s327_s13 = scalar_lea.hbm %s439_s1, 4096 }
   0x2   :  { %s16_s10 = sshll.u32 %s375_s9, 4  ;;  %p328_p0 = scmp.ne.s32.totalorder %s439_s1, %s327_s13  ;;  %s17_s10 = int_to_ptr.vmem [resolvable:$true] %s16_s10 }
   0x3   :  { %p331_p1 = scmp.lt.u32.totalorder %s327_s13, %s439_s1 }
   0x5   :  { %p333_p2 = pnand %p331_p1, %p328_p0 }
   0x7   :  { %336 = shalt.err (!%p333_p2)
}
   0x8   :  { %s337_s18 = scalar_lea.vmem %s17_s10, 4096  ;;  %p342_p4 = scmp.lt.s32.totalorder %s17_s10, %s17_s10 }
   0x9   :  { %p338_p3 = scmp.ne.s32.totalorder %s17_s10, %s337_s18  ;;  %p343_p5 = scmp.lt.s32.totalorder %s337_s18, %s337_s18 }
   0xb   :  { %p344_p6 = por %p343_p5, %p342_p4 }
   0xd   :  { %p345_p7 = pnand %p344_p6, %p338_p3 }
   0xf   :  { %348 = shalt.err (!%p345_p7)
}
  0x10   :  { %s376_s19 = smov 128   ;;  %s377_s20 = smov 8  }
  0x11   :  { %22 = dma.hbm_to_vmem [thread:$0]  %s439_s1, 4096, %s17_s10, [#allocation3], %s376_s19, %s376_s19, %s377_s20  }
  0x12   :  { %371 = dma.done.wait [#allocation3], 4096  }
  0x13   :  { %372 = vsyncadd [#allocation3], 4294963200  ;;  %v378_v0 = vmov 0   ;;  %v27_v1 = vld [vmem:[%s438_s0 + $0x8] sm:$0xff]  ;;  %v26_v2 = vld [vmem:[%s438_s0] sm:$0xff]  ;;  %v30_v53 = vlaneseq  ;;  %v379_v58 = vmov 1.0  }
  0x14   :  { %326 = vset.pattern.permute.xlu1 %v378_v0  ;;  %325 = vset.pattern.permute.xlu0 %v378_v0  ;;  %v29_v3 = vld [vmem:[%s438_s0 + $0x18] sm:$0xff]  ;;  %v28_v4 = vld [vmem:[%s438_s0 + $0x10] sm:$0xff]  ;;  %v85_v5 = vld [vmem:[#allocation2 + $0x80] sm:$0xff]  ;;  %s380_s0 = smov [#allocation5]  }
  0x15   :  { %37 = vperm.xlu1 %326, %v27_v1   ;;  %34 = vperm.xlu0 %325, %v26_v2   ;;  %v86_v6 = vld [vmem:[#allocation2 + $0x88] sm:$0xff]  ;;  %v69_v8 = vld [vmem:[#allocation2] sm:$0xff]  ;;  %v87_v10 = vld [vmem:[#allocation2 + $0x90] sm:$0xff]  ;;  %v31_v54 = vand.u32 127, %v30_v53  ;;  %s199_s30 = sshll.u32 %s380_s0, 4  ;;  %s200_s30 = int_to_ptr.vmem [resolvable:$true] %s199_s30 }
  0x16   :  { %v271_v7 = vpack.c.bf16 %v86_v6, %v85_v5  ;;  %v70_v9 = vld [vmem:[#allocation2 + $0x8] sm:$0xff]  ;;  %v88_v12 = vld [vmem:[#allocation2 + $0x98] sm:$0xff]  ;;  %v71_v13 = vld [vmem:[#allocation2 + $0x10] sm:$0xff]  ;;  %s349_s3 = scalar_lea.vmem %s200_s30, 512  ;;  %p354_p9 = scmp.lt.s32.totalorder %s200_s30, %s200_s30 }
  0x17   :  { %v273_v11 = vpack.c.bf16 %v70_v9, %v69_v8  ;;  %v72_v14 = vld [vmem:[#allocation2 + $0x18] sm:$0xff]  ;;  %v275_v15 = vpack.c.bf16 %v88_v12, %v87_v10  ;;  %v89_v16 = vld [vmem:[#allocation2 + $0xa0] sm:$0xff]  ;;  %v90_v17 = vld [vmem:[#allocation2 + $0xa8] sm:$0xff]  ;;  %v32_v55 = vadd.s32 128, %v31_v54  ;;  %p350_p8 = scmp.ne.s32.totalorder %s200_s30, %s349_s3  ;;  %p355_p10 = scmp.lt.s32.totalorder %s349_s3, %s349_s3 }
  0x18   :  { %272 = vmatprep.subr.bf16.mxu0 %v271_v7  ;;  %303 = vmatprep.subr.bf16.mxu1 %v271_v7  ;;  %v277_v18 = vpack.c.bf16 %v72_v14, %v71_v13  ;;  %v279_v19 = vpack.c.bf16 %v90_v17, %v89_v16  ;;  %v73_v20 = vld [vmem:[#allocation2 + $0x20] sm:$0xff]  ;;  %v74_v21 = vld [vmem:[#allocation2 + $0x28] sm:$0xff]  ;;  %v91_v22 = vld [vmem:[#allocation2 + $0xb0] sm:$0xff] }
  0x19   :  { %43 = vperm.xlu1 %326, %v29_v3   ;;  %40 = vperm.xlu0 %325, %v28_v4   ;;  %v92_v23 = vld [vmem:[#allocation2 + $0xb8] sm:$0xff]  ;;  %v281_v24 = vpack.c.bf16 %v74_v21, %v73_v20  ;;  %v75_v26 = vld [vmem:[#allocation2 + $0x30] sm:$0xff]  ;;  %v93_v28 = vld [vmem:[#allocation2 + $0xc0] sm:$0xff]  ;;  %p356_p11 = por %p355_p10, %p354_p9 }
  0x1a   :  { %274 = vmatpush3.bf16.msra.mxu0 %v273_v11  ;;  %311 = vmatpush3.bf16.msra.mxu1 %v273_v11  ;;  %v283_v25 = vpack.c.bf16 %v92_v23, %v91_v22  ;;  %v76_v27 = vld [vmem:[#allocation2 + $0x38] sm:$0xff]  ;;  %v94_v29 = vld [vmem:[#allocation2 + $0xc8] sm:$0xff]  ;;  %v77_v32 = vld [vmem:[#allocation2 + $0x40] sm:$0xff] }
  0x1b   :  { %276 = vmatprep.subr.bf16.mxu0 %v275_v15  ;;  %304 = vmatprep.subr.bf16.mxu1 %v275_v15  ;;  %v285_v30 = vpack.c.bf16 %v76_v27, %v75_v26  ;;  %v287_v31 = vpack.c.bf16 %v94_v29, %v93_v28  ;;  %v78_v33 = vld [vmem:[#allocation2 + $0x48] sm:$0xff]  ;;  %v95_v34 = vld [vmem:[#allocation2 + $0xd0] sm:$0xff]  ;;  %v96_v35 = vld [vmem:[#allocation2 + $0xd8] sm:$0xff]  ;;  %p357_p12 = pnand %p356_p11, %p350_p8 }
  0x1c   :  { %v289_v36 = vpack.c.bf16 %v78_v33, %v77_v32  ;;  %v291_v37 = vpack.c.bf16 %v96_v35, %v95_v34  ;;  %v79_v38 = vld [vmem:[#allocation2 + $0x50] sm:$0xff]  ;;  %v80_v39 = vld [vmem:[#allocation2 + $0x58] sm:$0xff]  ;;  %v97_v40 = vld [vmem:[#allocation2 + $0xe0] sm:$0xff] }
  0x1d   :  { %v98_v41 = vld [vmem:[#allocation2 + $0xe8] sm:$0xff]  ;;  %v293_v42 = vpack.c.bf16 %v80_v39, %v79_v38  ;;  %v81_v44 = vld [vmem:[#allocation2 + $0x60] sm:$0xff]  ;;  %v99_v46 = vld [vmem:[#allocation2 + $0xf0] sm:$0xff] }
  0x1e   :  { %278 = vmatpush3.bf16.msra.mxu0 %v277_v18  ;;  %312 = vmatpush3.bf16.msra.mxu1 %v277_v18  ;;  %v295_v43 = vpack.c.bf16 %v98_v41, %v97_v40  ;;  %v82_v45 = vld [vmem:[#allocation2 + $0x68] sm:$0xff]  ;;  %v100_v47 = vld [vmem:[#allocation2 + $0xf8] sm:$0xff]  ;;  %v83_v50 = vld [vmem:[#allocation2 + $0x70] sm:$0xff] }
  0x1f   :  { %280 = vmatprep.subr.bf16.mxu0 %v279_v19  ;;  %305 = vmatprep.subr.bf16.mxu1 %v279_v19  ;;  %v297_v48 = vpack.c.bf16 %v82_v45, %v81_v44  ;;  %v299_v49 = vpack.c.bf16 %v100_v47, %v99_v46  ;;  %v84_v51 = vld [vmem:[#allocation2 + $0x78] sm:$0xff] }
  0x20   :  { %v301_v52 = vpack.c.bf16 %v84_v51, %v83_v50 }
  0x22   :  { %282 = vmatpush3.bf16.msra.mxu0 %v281_v24  ;;  %313 = vmatpush3.bf16.msra.mxu1 %v281_v24 }
  0x23   :  { %284 = vmatprep.subr.bf16.mxu0 %v283_v25  ;;  %306 = vmatprep.subr.bf16.mxu1 %v283_v25 }
  0x26   :  { %286 = vmatpush3.bf16.msra.mxu0 %v285_v30  ;;  %314 = vmatpush3.bf16.msra.mxu1 %v285_v30 }
  0x27   :  { %288 = vmatprep.subr.bf16.mxu0 %v287_v31  ;;  %307 = vmatprep.subr.bf16.mxu1 %v287_v31 }
  0x2a   :  { %290 = vmatpush3.bf16.msra.mxu0 %v289_v36  ;;  %315 = vmatpush3.bf16.msra.mxu1 %v289_v36 }
  0x2b   :  { %292 = vmatprep.subr.bf16.mxu0 %v291_v37  ;;  %308 = vmatprep.subr.bf16.mxu1 %v291_v37 }
  0x2e   :  { %294 = vmatpush3.bf16.msra.mxu0 %v293_v42  ;;  %316 = vmatpush3.bf16.msra.mxu1 %v293_v42 }
  0x2f   :  { %296 = vmatprep.subr.bf16.mxu0 %v295_v43  ;;  %309 = vmatprep.subr.bf16.mxu1 %v295_v43 }
  0x32   :  { %298 = vmatpush3.bf16.msra.mxu0 %v297_v48  ;;  %317 = vmatpush3.bf16.msra.mxu1 %v297_v48 }
  0x33   :  { %300 = vmatprep.subr.bf16.mxu0 %v299_v49  ;;  %310 = vmatprep.subr.bf16.mxu1 %v299_v49 }
  0x36   :  { %302 = vmatpush3.bf16.msra.mxu0 %v301_v52  ;;  %318 = vmatpush3.bf16.msra.mxu1 %v301_v52 }
  0x94   :  { %v38_v56 = vpop.permute.xlu1 %37  ;;  %v35_v57 = vpop.permute.xlu0 %34 }
  0x95   :  { %vm48_vm0 = vcmp.eq.s32.totalorder %v32_v55, %v38_v56  ;;  %vm45_vm1 = vcmp.eq.s32.totalorder %v31_v54, %v35_v57  ;;  %vm46_vm2 = vcmp.eq.s32.totalorder %v32_v55, %v35_v57  ;;  %vm47_vm3 = vcmp.eq.s32.totalorder %v31_v54, %v38_v56 }
  0x96   :  { %219 = vmatprep.mubr.msk.f32.mxu0 %vm46_vm2, %v379_v58 }
  0x97   :  { %220 = vmatmul.mubr.msk.f32.vlgmr.msra.gmra.mrb[0].mxu0 %vm45_vm1, %v379_v58 }
  0x98   :  { %v44_v59 = vpop.permute.xlu1 %43  ;;  %v41_v60 = vpop.permute.xlu0 %40  ;;  %221 = vmatprep.mubr.msk.f32.mxu0 %vm48_vm0, %v379_v58 }
  0x99   :  { %vm49_vm4 = vcmp.eq.s32.totalorder %v31_v54, %v41_v60  ;;  %vm50_vm5 = vcmp.eq.s32.totalorder %v32_v55, %v41_v60  ;;  %vm52_vm6 = vcmp.eq.s32.totalorder %v32_v55, %v44_v59  ;;  %vm51_vm7 = vcmp.eq.s32.totalorder %v31_v54, %v44_v59 }
  0x9a   :  { %223 = vmatprep.mubr.msk.f32.mxu1 %vm50_vm5, %v379_v58 }
  0x9b   :  { %222 = vmatmul.mubr.msk.f32.gmra.mrb[2].mxu0 %vm47_vm3, %v379_v58  ;;  %224 = vmatmul.mubr.msk.f32.vlgmr.msra.gmra.mrb[0].mxu1 %vm49_vm4, %v379_v58 }
  0x9c   :  { %225 = vmatprep.mubr.msk.f32.mxu1 %vm52_vm6, %v379_v58 }
  0x9f   :  { %226 = vmatmul.mubr.msk.f32.gmra.mrb[2].mxu1 %vm51_vm7, %v379_v58 }
 0x16a   :  { %v259_v61 = vpop.f32.mrb[0].mxu0 }
 0x16b   :  { %v260_v62 = vpop.f32.mrb[1].mxu0 }
 0x16c   :  { %v261_v63 = vadd.f32 %v260_v62, %v259_v61 }
 0x16e   :  { %v186_v0 = vmul.f32 11.313708, %v261_v63  ;;  %v262_v1 = vpop.f32.mrb[2].mxu0  ;;  %v265_v2 = vpop.f32.mrb[0].mxu1 }
 0x16f   :  { %v263_v3 = vpop.f32.mrb[3].mxu0  ;;  %v266_v4 = vpop.f32.mrb[1].mxu1 }
 0x170   :  { %190 = vst [vmem:[#allocation5] sm:$0xff] %v186_v0  ;;  %v264_v5 = vadd.f32 %v263_v3, %v262_v1  ;;  %v267_v6 = vadd.f32 %v266_v4, %v265_v2 }
 0x172   :  { %v187_v7 = vmul.f32 11.313708, %v264_v5  ;;  %v188_v8 = vmul.f32 11.313708, %v267_v6  ;;  %v268_v9 = vpop.f32.mrb[2].mxu1 }
 0x173   :  { %v269_v10 = vpop.f32.mrb[3].mxu1 }
 0x174   :  { %191 = vst [vmem:[#allocation5 + $0x8] sm:$0xff] %v187_v7  ;;  %192 = vst [vmem:[#allocation5 + $0x10] sm:$0xff] %v188_v8  ;;  %v270_v11 = vadd.f32 %v269_v10, %v268_v9 }
 0x176   :  { %v189_v12 = vmul.f32 11.313708, %v270_v11 }
 0x178   :  { %193 = vst [vmem:[#allocation5 + $0x18] sm:$0xff] %v189_v12 }
 0x179   :  { %360 = shalt.err (!%p357_p12)
}
 0x17a   :  { %s361_s6 = scalar_lea.hbm %s440_s2, 512 }
 0x17b   :  { %p362_p13 = scmp.ne.s32.totalorder %s440_s2, %s361_s6  ;;  %p365_p0 = scmp.lt.u32.totalorder %s361_s6, %s440_s2 }
 0x17d   :  { %p367_p1 = pnand %p365_p0, %p362_p13 }
 0x17f   :  { %370 = shalt.err (!%p367_p1)
}
 0x180   :  { %205 = dma.vmem_to_hbm [thread:$0]  %s200_s30, 512, %s440_s2, [#allocation4], %s376_s19, %s376_s19, %s377_s20  }
 0x181   :  { %373 = dma.done.wait [#allocation4], 512  }
 0x182   :  { %374 = vsyncadd [#allocation4], 4294966784 }
 0x183   :  { %209 = vsyncpa [#allocation3], 1 }
 0x184   :  { %210 = vsyncpa [#allocation4], 1 }

</bundles_post_ra>
